<compile_context>
chip_gen: v5e
topology: v5e:2x2
jax: 0.10.0
libtpu: 0.0.40
codegen_flags: <defaults>
</compile_context>

<pallas_src>
import functools
import math

import jax
import jax.numpy as jnp
import numpy as np
from jax.experimental import pallas as pl
from jax.experimental.pallas import tpu as pltpu


def _dwconv_gelu_kernel(xl_ref, xc_ref, xr_ref, w_ref, b_ref, o_ref, xp_ref,
                        *, n_seq, tile_n, hb, k_size):
    """One (batch, seq-tile) grid step of depthwise conv1d + bias + GELU.

    xl_ref: (1, HB, C)  rows just BEFORE this tile (clamped at the left edge)
    xc_ref: (1, TN, C)  current sequence tile
    xr_ref: (1, HB, C)  rows just AFTER this tile (clamped at the right edge)
    w_ref : (K, C)      depthwise taps, w[k, c] == torch_weight[c, 0, k]
    b_ref : (1, C)      bias
    o_ref : (1, TN, C)  output tile
    xp_ref: (TN + 2*HB, C) VMEM scratch: [left halo | tile | right halo]
    """
    pad = k_size // 2
    tn = tile_n
    i = pl.program_id(1)                      # sequence-tile index
    C = o_ref.shape[2]
    P = tn + 2 * hb                           # padded-scratch rows (static)

    # ---- assemble the zero-padded tile in VMEM (input dtype) ----
    # pl.when-gated: interior tiles take unmasked plain copies; the masked
    # (iota + compare + select) paths only run on edge / ragged tiles.

    # Left halo: Conv1d zero padding on the very first tile, plain copy after.
    @pl.when(i == 0)
    def _():
        xp_ref[0:hb, :] = jnp.zeros((hb, C), dtype=xp_ref.dtype)

    @pl.when(i > 0)
    def _():
        xp_ref[0:hb, :] = xl_ref[0]

    # Center tile: only the ragged last tile needs its garbage rows zeroed.
    is_ragged = (i + 1) * tn > n_seq

    @pl.when(jnp.logical_not(is_ragged))
    def _():
        xp_ref[hb:hb + tn, :] = xc_ref[0]

    @pl.when(is_ragged)
    def _():
        xc = xc_ref[0]
        row = jax.lax.broadcasted_iota(jnp.int32, (tn, 1), 0)
        xp_ref[hb:hb + tn, :] = jnp.where(i * tn + row < n_seq,
                                          xc, jnp.zeros_like(xc))

    # Right halo: plain copy unless it spills past the end of the sequence
    # (covers both the clamped index map and Conv1d's right zero padding).
    right_full = (i + 1) * tn + hb <= n_seq

    @pl.when(right_full)
    def _():
        xp_ref[hb + tn:hb + tn + hb, :] = xr_ref[0]

    @pl.when(jnp.logical_not(right_full))
    def _():
        xr = xr_ref[0]
        row = jax.lax.broadcasted_iota(jnp.int32, (hb, 1), 0)
        xp_ref[hb + tn:hb + tn + hb, :] = jnp.where((i + 1) * tn + row < n_seq,
                                                    xr, jnp.zeros_like(xr))

    # ---- depthwise conv + bias (f32 accumulation) ----
    w = w_ref[...].astype(jnp.float32)        # (K, C), read once per tile
    bias = b_ref[...].astype(jnp.float32)     # (1, C), read once per tile
    acc = jnp.broadcast_to(bias, (tn, C))     # start from the bias (hoisted)

    # One aligned load of the padded tile (stays in the input dtype); each tap
    # is a static sublane rotate (XLU) of it instead of a misaligned slice.
    xp = xp_ref[...]                          # (P, C)
    for k in range(k_size):                   # small static K -> fully unrolled
        off = hb - pad + k                    # want tap[r] = xp[r + off]
        sh = (P - off) % P                    # jnp.roll convention: res[r] = x[(r - sh) % P]
        tap_full = xp if sh == 0 else pltpu.roll(xp, shift=sh, axis=0)
        tap = tap_full[0:tn, :].astype(jnp.float32)
        acc = acc + tap * w[k:k + 1, :]

    # ---- exact erf GELU (matches torch.nn.GELU(approximate='none')) ----
    inv_sqrt2 = jnp.float32(1.0 / math.sqrt(2.0))
    y = 0.5 * acc * (1.0 + jax.lax.erf(acc * inv_sqrt2))
    o_ref[0] = y.astype(o_ref.dtype)


def conv_position_embed(x, weight_kc, bias_c, kernel_size, *, tile_n=None):
    """x: (B, N, C); weight_kc: (K, C); bias_c: (C,). Returns (B, N, C)."""
    B, N, C = x.shape
    K = int(kernel_size)
    assert K % 2 == 1, "kernel_size must be odd (matches ConvPositionEmbed)"
    assert weight_kc.shape == (K, C) and bias_c.shape == (C,)
    pad = K // 2

    # Lane-dense channels: pad C up to a multiple of 128 so output stores are
    # full-lane vst and the sublane rolls see a native lane layout.  No-op for
    # production dims (512 / 1024).
    # TODO(synk): for odd channel counts a masked in-kernel final store would
    # avoid this extra HBM copy; kept host-side for lane density / simplicity.
    LANE = 128
    Cp = ((C + LANE - 1) // LANE) * LANE
    if Cp != C:
        x = jnp.pad(x, ((0, 0), (0, 0), (0, Cp - C)))
        weight_kc = jnp.pad(weight_kc, ((0, 0), (0, Cp - C)))
        bias_c = jnp.pad(bias_c, ((0, Cp - C),))

    # Halo block: >= pad rows, multiple of 8 sublanes, divides the tile size.
    HB = max(8, int(pl.next_power_of_2(max(pad, 1))))

    if tile_n is None:
        # Default 1024-row tile: fewer grid steps, larger DMAs.  When B == 1,
        # shrink so there are >= 2 sequence tiles (keeps both v7x TCs busy).
        tn = 1024
        if B == 1:
            tn = min(tn, ((pl.cdiv(N, 2) + HB - 1) // HB) * HB)
    else:
        tn = int(tile_n)
    tn = min(tn, ((N + HB - 1) // HB) * HB)        # never exceed the sequence
    tn = max(((tn + HB - 1) // HB) * HB, HB)       # multiple of HB (and of 8)
    assert tn % 8 == 0 and tn % HB == 0 and HB >= pad

    nt = pl.cdiv(N, tn)            # sequence tiles (grid axis 1)
    R = tn // HB                   # HB-blocks per tile
    nHB = pl.cdiv(N, HB)           # HB-blocks covering the sequence
    P = tn + 2 * HB                # padded tile rows in the VMEM scratch

    bias_2d = bias_c.reshape(1, Cp)

    kernel = functools.partial(_dwconv_gelu_kernel,
                               n_seq=N, tile_n=tn, hb=HB, k_size=K)

    # Per-step VMEM footprint (double-buffered center in/out + halos + scratch
    # + weights/bias).  ~20.3 MiB at tn=1024, Cp=1024, f32; pass an explicit
    # scoped-VMEM limit (with headroom) so the default tile also compiles
    # under v5e's smaller scoped default while staying far below v7x's 64 MiB
    # physical VMEM.
    itemsize = jnp.dtype(x.dtype).itemsize
    vmem_bytes = (2 * 2 * tn * Cp * itemsize       # center input + output, x2 buffers
                  + 2 * 2 * HB * Cp * itemsize     # left/right halos, x2 buffers
                  + P * Cp * itemsize              # assembly scratch (single)
                  + 2 * (K + 1) * Cp * 4)          # weights + bias
    vmem_limit = max(int(vmem_bytes * 5 // 4) + (2 << 20), 16 << 20)

    out = pl.pallas_call(
        kernel,
        out_shape=jax.ShapeDtypeStruct((B, N, Cp), x.dtype),
        grid=(B, nt),
        in_specs=[
            # left halo: HB rows just before this tile (clamped at left edge)
            pl.BlockSpec((1, HB, Cp),
                         lambda b, i: (b, jnp.maximum(i * R - 1, 0), 0)),
            # current tile
            pl.BlockSpec((1, tn, Cp), lambda b, i: (b, i, 0)),
            # right halo: HB rows just after this tile (clamped at right edge)
            pl.BlockSpec((1, HB, Cp),
                         lambda b, i: (b, jnp.minimum((i + 1) * R, nHB - 1), 0)),
            # depthwise taps + bias (resident across the grid)
            pl.BlockSpec((K, Cp), lambda b, i: (0, 0)),
            pl.BlockSpec((1, Cp), lambda b, i: (0, 0)),
        ],
        out_specs=pl.BlockSpec((1, tn, Cp), lambda b, i: (b, i, 0)),
        scratch_shapes=[pltpu.VMEM((P, Cp), x.dtype)],
        compiler_params=pltpu.CompilerParams(
            dimension_semantics=("parallel", "parallel"),
            vmem_limit_bytes=vmem_limit),
    )(x, x, x, weight_kc, bias_2d)

    if Cp != C:
        out = out[..., :C]
    return out


def reference_conv_position_embed(x, weight_kc, bias_c, kernel_size):
    """Pure-JAX reference (depthwise conv_general_dilated + exact GELU)."""
    B, N, C = x.shape
    K = kernel_size
    pad = K // 2
    rhs = jnp.transpose(weight_kc, (1, 0)).reshape(C, 1, K)   # (C, 1, K)
    lhs = jnp.transpose(x, (0, 2, 1))                         # (B, C, N)
    y = jax.lax.conv_general_dilated(
        lhs, rhs, window_strides=(1,), padding=[(pad, pad)],
        dimension_numbers=("NCH", "OIH", "NCH"), feature_group_count=C,
        precision=jax.lax.Precision.HIGHEST)
    y = y + bias_c.reshape(1, C, 1)
    y = 0.5 * y * (1.0 + jax.lax.erf(y / jnp.sqrt(2.0)))
    return jnp.transpose(y, (0, 2, 1))                        # (B, N, C)


if __name__ == "__main__":
    root = jax.random.PRNGKey(0)

    def run_case(case_idx, B, N, C, K, tn):
        kx, kw, kb = jax.random.split(jax.random.fold_in(root, case_idx), 3)
        x = jax.random.normal(kx, (B, N, C), dtype=jnp.float32)
        # torch Conv1d depthwise init bounds: fan_in = K
        bound = 1.0 / math.sqrt(K)
        w = jax.random.uniform(kw, (K, C), jnp.float32,
                               minval=-bound, maxval=bound)
        b = jax.random.uniform(kb, (C,), jnp.float32,
                               minval=-bound, maxval=bound)
        out = jax.block_until_ready(
            conv_position_embed(x, w, b, K, tile_n=tn))
        ref = reference_conv_position_embed(x, w, b, K)
        np.testing.assert_allclose(np.asarray(out), np.asarray(ref),
                                   rtol=1e-5, atol=1e-5)

    # Small shapes consistent with the module's (batch, seq, dim) input.
    run_case(0, B=2, N=100, C=32,  K=7,  tn=32)    # multi-tile, ragged tail, C < 128
    run_case(1, B=2, N=64,  C=128, K=7,  tn=None)  # default tile path, lane-dense C
    run_case(2, B=1, N=64,  C=128, K=31, tn=32)    # wide kernel (pad=15), B=1 -> 2 tiles

    print("KERNEL_OK")
</pallas_src>

<mosaic_0001>
module attributes {stable_mosaic.version = 11 : i64} {
  func.func @_dwconv_gelu_kernel(%arg0: i32, %arg1: i32, %arg2: memref<1x8x128xf32, #tpu.memory_space<vmem>>, %arg3: memref<1x32x128xf32, #tpu.memory_space<vmem>>, %arg4: memref<1x8x128xf32, #tpu.memory_space<vmem>>, %arg5: memref<7x128xf32, #tpu.memory_space<vmem>>, %arg6: memref<1x128xf32, #tpu.memory_space<vmem>>, %arg7: memref<1x32x128xf32, #tpu.memory_space<vmem>>, %arg8: memref<48x128xf32, #tpu.memory_space<vmem>>) attributes {dimension_semantics = [#tpu.dimension_semantics<parallel>, #tpu.dimension_semantics<parallel>], iteration_bounds = array<i64: 2, 4>, scalar_prefetch = 0 : i64, scratch_operands = 1 : i64, tpu.core_type = #tpu.core_type<tc>, window_params = [{transform_indices = @transform_0, window_bounds = array<i64: 1, 8, 128>}, {transform_indices = @transform_1, window_bounds = array<i64: 1, 32, 128>}, {transform_indices = @transform_2, window_bounds = array<i64: 1, 8, 128>}, {pipeline_mode = #tpu.pipeline_mode<synchronous>, transform_indices = @transform_3, window_bounds = array<i64: 7, 128>}, {pipeline_mode = #tpu.pipeline_mode<synchronous>, transform_indices = @transform_4, window_bounds = array<i64: 1, 128>}, {transform_indices = @transform_5, window_bounds = array<i64: 1, 32, 128>}]} {
    %c0_i32 = arith.constant 0 : i32
    %0 = arith.cmpi eq, %arg1, %c0_i32 : i32
    %1 = arith.extui %0 : i1 to i32
    %c0_i32_0 = arith.constant 0 : i32
    %2 = arith.cmpi ne, %1, %c0_i32_0 : i32
    scf.if %2 {
      %cst_21 = arith.constant 0.000000e+00 : f32
      %81 = vector.broadcast %cst_21 : f32 to vector<8x128xf32>
      %c0_22 = arith.constant 0 : index
      %c0_23 = arith.constant 0 : index
      %82 = vector.load %arg8[%c0_22, %c0_23] : memref<48x128xf32, #tpu.memory_space<vmem>>, vector<8x128xf32>
      tpu.vector_store %arg8[%c0_22, %c0_23], %81 {strides = array<i32>} : memref<48x128xf32, #tpu.memory_space<vmem>>, vector<8x128xf32>,
    } else {
    }
    %c0_i32_1 = arith.constant 0 : i32
    %3 = arith.cmpi sgt, %arg1, %c0_i32_1 : i32
    %4 = arith.extui %3 : i1 to i32
    %c0_i32_2 = arith.constant 0 : i32
    %5 = arith.cmpi ne, %4, %c0_i32_2 : i32
    scf.if %5 {
      %c0_21 = arith.constant 0 : index
      %c0_22 = arith.constant 0 : index
      %c0_23 = arith.constant 0 : index
      %81 = vector.load %arg2[%c0_21, %c0_22, %c0_23] : memref<1x8x128xf32, #tpu.memory_space<vmem>>, vector<1x8x128xf32>
      %82 = vector.shape_cast %81 : vector<1x8x128xf32> to vector<8x128xf32>
      %c0_24 = arith.constant 0 : index
      %c0_25 = arith.constant 0 : index
      %83 = vector.load %arg8[%c0_24, %c0_25] : memref<48x128xf32, #tpu.memory_space<vmem>>, vector<8x128xf32>
      tpu.vector_store %arg8[%c0_24, %c0_25], %82 {strides = array<i32>} : memref<48x128xf32, #tpu.memory_space<vmem>>, vector<8x128xf32>,
    } else {
    }
    %c1_i32 = arith.constant 1 : i32
    %6 = arith.addi %arg1, %c1_i32 : i32
    %c32_i32 = arith.constant 32 : i32
    %7 = arith.muli %6, %c32_i32 : i32
    %c100_i32 = arith.constant 100 : i32
    %8 = arith.cmpi sgt, %7, %c100_i32 : i32
    %true = arith.constant true
    %9 = arith.xori %8, %true : i1
    %10 = arith.extui %9 : i1 to i32
    %c0_i32_3 = arith.constant 0 : i32
    %11 = arith.cmpi ne, %10, %c0_i32_3 : i32
    scf.if %11 {
      %c0_21 = arith.constant 0 : index
      %c0_22 = arith.constant 0 : index
      %c0_23 = arith.constant 0 : index
      %81 = vector.load %arg3[%c0_21, %c0_22, %c0_23] : memref<1x32x128xf32, #tpu.memory_space<vmem>>, vector<1x32x128xf32>
      %82 = vector.shape_cast %81 : vector<1x32x128xf32> to vector<32x128xf32>
      %c8 = arith.constant 8 : index
      %c0_24 = arith.constant 0 : index
      %83 = vector.load %arg8[%c8, %c0_24] : memref<48x128xf32, #tpu.memory_space<vmem>>, vector<32x128xf32>
      tpu.vector_store %arg8[%c8, %c0_24], %82 {strides = array<i32>} : memref<48x128xf32, #tpu.memory_space<vmem>>, vector<32x128xf32>,
    } else {
    }
    %12 = arith.extui %8 : i1 to i32
    %c0_i32_4 = arith.constant 0 : i32
    %13 = arith.cmpi ne, %12, %c0_i32_4 : i32
    scf.if %13 {
      %c0_21 = arith.constant 0 : index
      %c0_22 = arith.constant 0 : index
      %c0_23 = arith.constant 0 : index
      %81 = vector.load %arg3[%c0_21, %c0_22, %c0_23] : memref<1x32x128xf32, #tpu.memory_space<vmem>>, vector<1x32x128xf32>
      %82 = vector.shape_cast %81 : vector<1x32x128xf32> to vector<32x128xf32>
      %83 = tpu.iota {dimensions = array<i32: 0>} : vector<32x1xi32>
      %c32_i32_24 = arith.constant 32 : i32
      %84 = arith.muli %arg1, %c32_i32_24 : i32
      %85 = vector.broadcast %84 : i32 to vector<32x1xi32>
      %86 = arith.addi %85, %83 : vector<32x1xi32>
      %c100_i32_25 = arith.constant 100 : i32
      %87 = vector.broadcast %c100_i32_25 : i32 to vector<32x1xi32>
      %88 = arith.cmpi slt, %86, %87 : vector<32x1xi32>
      %cst_26 = arith.constant 0.000000e+00 : f32
      %89 = vector.broadcast %cst_26 : f32 to vector<32x128xf32>
      %90 = vector.shape_cast %88 : vector<32x1xi1> to vector<32x1xi1>
      %91 = vector.broadcast %90 : vector<32x1xi1> to vector<32x128xi1>
      %92 = arith.select %91, %82, %89 : vector<32x128xi1>, vector<32x128xf32>
      %c8 = arith.constant 8 : index
      %c0_27 = arith.constant 0 : index
      %93 = vector.load %arg8[%c8, %c0_27] : memref<48x128xf32, #tpu.memory_space<vmem>>, vector<32x128xf32>
      tpu.vector_store %arg8[%c8, %c0_27], %92 {strides = array<i32>} : memref<48x128xf32, #tpu.memory_space<vmem>>, vector<32x128xf32>,
    } else {
    }
    %c1_i32_5 = arith.constant 1 : i32
    %14 = arith.addi %arg1, %c1_i32_5 : i32
    %c32_i32_6 = arith.constant 32 : i32
    %15 = arith.muli %14, %c32_i32_6 : i32
    %c8_i32 = arith.constant 8 : i32
    %16 = arith.addi %15, %c8_i32 : i32
    %c100_i32_7 = arith.constant 100 : i32
    %17 = arith.cmpi sle, %16, %c100_i32_7 : i32
    %18 = arith.extui %17 : i1 to i32
    %c0_i32_8 = arith.constant 0 : i32
    %19 = arith.cmpi ne, %18, %c0_i32_8 : i32
    scf.if %19 {
      %c0_21 = arith.constant 0 : index
      %c0_22 = arith.constant 0 : index
      %c0_23 = arith.constant 0 : index
      %81 = vector.load %arg4[%c0_21, %c0_22, %c0_23] : memref<1x8x128xf32, #tpu.memory_space<vmem>>, vector<1x8x128xf32>
      %82 = vector.shape_cast %81 : vector<1x8x128xf32> to vector<8x128xf32>
      %c40 = arith.constant 40 : index
      %c0_24 = arith.constant 0 : index
      %83 = vector.load %arg8[%c40, %c0_24] : memref<48x128xf32, #tpu.memory_space<vmem>>, vector<8x128xf32>
      tpu.vector_store %arg8[%c40, %c0_24], %82 {strides = array<i32>} : memref<48x128xf32, #tpu.memory_space<vmem>>, vector<8x128xf32>,
    } else {
    }
    %true_9 = arith.constant true
    %20 = arith.xori %17, %true_9 : i1
    %21 = arith.extui %20 : i1 to i32
    %c0_i32_10 = arith.constant 0 : i32
    %22 = arith.cmpi ne, %21, %c0_i32_10 : i32
    scf.if %22 {
      %c0_21 = arith.constant 0 : index
      %c0_22 = arith.constant 0 : index
      %c0_23 = arith.constant 0 : index
      %81 = vector.load %arg4[%c0_21, %c0_22, %c0_23] : memref<1x8x128xf32, #tpu.memory_space<vmem>>, vector<1x8x128xf32>
      %82 = vector.shape_cast %81 : vector<1x8x128xf32> to vector<8x128xf32>
      %83 = tpu.iota {dimensions = array<i32: 0>} : vector<8x1xi32>
      %c1_i32_24 = arith.constant 1 : i32
      %84 = arith.addi %arg1, %c1_i32_24 : i32
      %c32_i32_25 = arith.constant 32 : i32
      %85 = arith.muli %84, %c32_i32_25 : i32
      %86 = vector.broadcast %85 : i32 to vector<8x1xi32>
      %87 = arith.addi %86, %83 : vector<8x1xi32>
      %c100_i32_26 = arith.constant 100 : i32
      %88 = vector.broadcast %c100_i32_26 : i32 to vector<8x1xi32>
      %89 = arith.cmpi slt, %87, %88 : vector<8x1xi32>
      %cst_27 = arith.constant 0.000000e+00 : f32
      %90 = vector.broadcast %cst_27 : f32 to vector<8x128xf32>
      %91 = vector.shape_cast %89 : vector<8x1xi1> to vector<8x1xi1>
      %92 = vector.broadcast %91 : vector<8x1xi1> to vector<8x128xi1>
      %93 = arith.select %92, %82, %90 : vector<8x128xi1>, vector<8x128xf32>
      %c40 = arith.constant 40 : index
      %c0_28 = arith.constant 0 : index
      %94 = vector.load %arg8[%c40, %c0_28] : memref<48x128xf32, #tpu.memory_space<vmem>>, vector<8x128xf32>
      tpu.vector_store %arg8[%c40, %c0_28], %93 {strides = array<i32>} : memref<48x128xf32, #tpu.memory_space<vmem>>, vector<8x128xf32>,
    } else {
    }
    %c0 = arith.constant 0 : index
    %c0_11 = arith.constant 0 : index
    %23 = vector.load %arg5[%c0, %c0_11] : memref<7x128xf32, #tpu.memory_space<vmem>>, vector<7x128xf32>
    %c0_12 = arith.constant 0 : index
    %c0_13 = arith.constant 0 : index
    %24 = vector.load %arg6[%c0_12, %c0_13] : memref<1x128xf32, #tpu.memory_space<vmem>>, vector<1x128xf32>
    %25 = vector.shape_cast %24 : vector<1x128xf32> to vector<1x128xf32>
    %26 = vector.broadcast %25 : vector<1x128xf32> to vector<32x128xf32>
    %c0_14 = arith.constant 0 : index
    %c0_15 = arith.constant 0 : index
    %27 = vector.load %arg8[%c0_14, %c0_15] : memref<48x128xf32, #tpu.memory_space<vmem>>, vector<48x128xf32>
    %c43_i32 = arith.constant 43 : i32
    %28 = tpu.dynamic_rotate %27 by %c43_i32 dim 0 : vector<48x128xf32>, i32 -> vector<48x128xf32>
    %29 = vector.extract_strided_slice %28 {offsets = [0, 0], sizes = [32, 128], strides = [1, 1]} : vector<48x128xf32> to vector<32x128xf32>
    %30 = vector.extract_strided_slice %23 {offsets = [0, 0], sizes = [1, 128], strides = [1, 1]} : vector<7x128xf32> to vector<1x128xf32>
    %31 = vector.broadcast %30 : vector<1x128xf32> to vector<32x128xf32>
    %32 = arith.mulf %29, %31 : vector<32x128xf32>
    %33 = arith.addf %26, %32 : vector<32x128xf32>
    %c42_i32 = arith.constant 42 : i32
    %34 = tpu.dynamic_rotate %27 by %c42_i32 dim 0 : vector<48x128xf32>, i32 -> vector<48x128xf32>
    %35 = vector.extract_strided_slice %34 {offsets = [0, 0], sizes = [32, 128], strides = [1, 1]} : vector<48x128xf32> to vector<32x128xf32>
    %36 = vector.extract_strided_slice %23 {offsets = [1, 0], sizes = [1, 128], strides = [1, 1]} : vector<7x128xf32> to vector<1x128xf32>
    %37 = vector.broadcast %36 : vector<1x128xf32> to vector<32x128xf32>
    %38 = arith.mulf %35, %37 : vector<32x128xf32>
    %39 = arith.addf %33, %38 : vector<32x128xf32>
    %c41_i32 = arith.constant 41 : i32
    %40 = tpu.dynamic_rotate %27 by %c41_i32 dim 0 : vector<48x128xf32>, i32 -> vector<48x128xf32>
    %41 = vector.extract_strided_slice %40 {offsets = [0, 0], sizes = [32, 128], strides = [1, 1]} : vector<48x128xf32> to vector<32x128xf32>
    %42 = vector.extract_strided_slice %23 {offsets = [2, 0], sizes = [1, 128], strides = [1, 1]} : vector<7x128xf32> to vector<1x128xf32>
    %43 = vector.broadcast %42 : vector<1x128xf32> to vector<32x128xf32>
    %44 = arith.mulf %41, %43 : vector<32x128xf32>
    %45 = arith.addf %39, %44 : vector<32x128xf32>
    %c40_i32 = arith.constant 40 : i32
    %46 = tpu.dynamic_rotate %27 by %c40_i32 dim 0 : vector<48x128xf32>, i32 -> vector<48x128xf32>
    %47 = vector.extract_strided_slice %46 {offsets = [0, 0], sizes = [32, 128], strides = [1, 1]} : vector<48x128xf32> to vector<32x128xf32>
    %48 = vector.extract_strided_slice %23 {offsets = [3, 0], sizes = [1, 128], strides = [1, 1]} : vector<7x128xf32> to vector<1x128xf32>
    %49 = vector.broadcast %48 : vector<1x128xf32> to vector<32x128xf32>
    %50 = arith.mulf %47, %49 : vector<32x128xf32>
    %51 = arith.addf %45, %50 : vector<32x128xf32>
    %c39_i32 = arith.constant 39 : i32
    %52 = tpu.dynamic_rotate %27 by %c39_i32 dim 0 : vector<48x128xf32>, i32 -> vector<48x128xf32>
    %53 = vector.extract_strided_slice %52 {offsets = [0, 0], sizes = [32, 128], strides = [1, 1]} : vector<48x128xf32> to vector<32x128xf32>
    %54 = vector.extract_strided_slice %23 {offsets = [4, 0], sizes = [1, 128], strides = [1, 1]} : vector<7x128xf32> to vector<1x128xf32>
    %55 = vector.broadcast %54 : vector<1x128xf32> to vector<32x128xf32>
    %56 = arith.mulf %53, %55 : vector<32x128xf32>
    %57 = arith.addf %51, %56 : vector<32x128xf32>
    %c38_i32 = arith.constant 38 : i32
    %58 = tpu.dynamic_rotate %27 by %c38_i32 dim 0 : vector<48x128xf32>, i32 -> vector<48x128xf32>
    %59 = vector.extract_strided_slice %58 {offsets = [0, 0], sizes = [32, 128], strides = [1, 1]} : vector<48x128xf32> to vector<32x128xf32>
    %60 = vector.extract_strided_slice %23 {offsets = [5, 0], sizes = [1, 128], strides = [1, 1]} : vector<7x128xf32> to vector<1x128xf32>
    %61 = vector.broadcast %60 : vector<1x128xf32> to vector<32x128xf32>
    %62 = arith.mulf %59, %61 : vector<32x128xf32>
    %63 = arith.addf %57, %62 : vector<32x128xf32>
    %c37_i32 = arith.constant 37 : i32
    %64 = tpu.dynamic_rotate %27 by %c37_i32 dim 0 : vector<48x128xf32>, i32 -> vector<48x128xf32>
    %65 = vector.extract_strided_slice %64 {offsets = [0, 0], sizes = [32, 128], strides = [1, 1]} : vector<48x128xf32> to vector<32x128xf32>
    %66 = vector.extract_strided_slice %23 {offsets = [6, 0], sizes = [1, 128], strides = [1, 1]} : vector<7x128xf32> to vector<1x128xf32>
    %67 = vector.broadcast %66 : vector<1x128xf32> to vector<32x128xf32>
    %68 = arith.mulf %65, %67 : vector<32x128xf32>
    %69 = arith.addf %63, %68 : vector<32x128xf32>
    %cst = arith.constant 5.000000e-01 : f32
    %70 = vector.broadcast %cst : f32 to vector<32x128xf32>
    %71 = arith.mulf %70, %69 : vector<32x128xf32>
    %cst_16 = arith.constant 0.707106769 : f32
    %72 = vector.broadcast %cst_16 : f32 to vector<32x128xf32>
    %73 = arith.mulf %69, %72 : vector<32x128xf32>
    %74 = math.erf %73 : vector<32x128xf32>
    %cst_17 = arith.constant 1.000000e+00 : f32
    %75 = vector.broadcast %cst_17 : f32 to vector<32x128xf32>
    %76 = arith.addf %75, %74 : vector<32x128xf32>
    %77 = arith.mulf %71, %76 : vector<32x128xf32>
    %c0_18 = arith.constant 0 : index
    %c0_19 = arith.constant 0 : index
    %c0_20 = arith.constant 0 : index
    %78 = vector.load %arg7[%c0_18, %c0_19, %c0_20] : memref<1x32x128xf32, #tpu.memory_space<vmem>>, vector<1x32x128xf32>
    %79 = vector.shape_cast %78 : vector<1x32x128xf32> to vector<32x128xf32>
    %80 = vector.shape_cast %77 : vector<32x128xf32> to vector<1x32x128xf32>
    tpu.vector_store %arg7[%c0_18, %c0_19, %c0_20], %80 {strides = array<i32>} : memref<1x32x128xf32, #tpu.memory_space<vmem>>, vector<1x32x128xf32>,
    return
  }
  func.func @transform_0(%arg0: i32, %arg1: i32) -> (i32, i32, i32) {
    %c4_i32 = arith.constant 4 : i32
    %0 = arith.muli %arg1, %c4_i32 : i32
    %c1_i32 = arith.constant 1 : i32
    %1 = arith.subi %0, %c1_i32 : i32
    %c0_i32 = arith.constant 0 : i32
    %2 = arith.maxsi %1, %c0_i32 : i32
    %c0_i32_0 = arith.constant 0 : i32
    %c0_i32_1 = arith.constant 0 : i32
    return %arg0, %2, %c0_i32_0 : i32, i32, i32
  }
  func.func @transform_1(%arg0: i32, %arg1: i32) -> (i32, i32, i32) {
    %c0_i32 = arith.constant 0 : i32
    %c0_i32_0 = arith.constant 0 : i32
    return %arg0, %arg1, %c0_i32 : i32, i32, i32
  }
  func.func @transform_2(%arg0: i32, %arg1: i32) -> (i32, i32, i32) {
    %c1_i32 = arith.constant 1 : i32
    %0 = arith.addi %arg1, %c1_i32 : i32
    %c4_i32 = arith.constant 4 : i32
    %1 = arith.muli %0, %c4_i32 : i32
    %c12_i32 = arith.constant 12 : i32
    %2 = arith.minsi %1, %c12_i32 : i32
    %c0_i32 = arith.constant 0 : i32
    %c0_i32_0 = arith.constant 0 : i32
    return %arg0, %2, %c0_i32 : i32, i32, i32
  }
  func.func @transform_3(%arg0: i32, %arg1: i32) -> (i32, i32) {
    %c0_i32 = arith.constant 0 : i32
    %c0_i32_0 = arith.constant 0 : i32
    %c0_i32_1 = arith.constant 0 : i32
    return %c0_i32, %c0_i32_0 : i32, i32
  }
  func.func @transform_4(%arg0: i32, %arg1: i32) -> (i32, i32) {
    %c0_i32 = arith.constant 0 : i32
    %c0_i32_0 = arith.constant 0 : i32
    %c0_i32_1 = arith.constant 0 : i32
    return %c0_i32, %c0_i32_0 : i32, i32
  }
  func.func @transform_5(%arg0: i32, %arg1: i32) -> (i32, i32, i32) {
    %c0_i32 = arith.constant 0 : i32
    %c0_i32_0 = arith.constant 0 : i32
    return %arg0, %arg1, %c0_i32 : i32, i32, i32
  }
}

</mosaic_0001>

<bundles_post_ra>
// kernel: tpu_custom_call.1
= control target key start
LH: loop header
LB: loop body
LE: loop exit
PB: predicated region body
PF: predicated region fallthrough
CT: control target
= control target key end

     0   :  { %s1430_s18 = smov 0   ;;  %s1432_s19 = smov 0   ;;  %s1770_s0 = inlined_call_operand.vmem [shape: f32[2,100,128], index: 0, kind: input, shape index: {}]   ;;  %s1771_s1 = inlined_call_operand.vmem [shape: f32[2,100,128], index: 1, kind: input, shape index: {}]   ;;  %s1772_s2 = inlined_call_operand.vmem [shape: f32[2,100,128], index: 2, kind: input, shape index: {}]   ;;  %s1773_s3 = inlined_call_operand.vmem [shape: f32[7,128], index: 3, kind: input, shape index: {}]   ;;  %s1774_s4 = inlined_call_operand.vmem [shape: f32[1,128], index: 4, kind: input, shape index: {}]   ;;  %s1775_s5 = inlined_call_operand.vmem [shape: f32[2,100,128], index: 5, kind: output, shape index: {}]  }
   0x1   :  { %s1434_s20 = smov 0   ;;  %s1436_s21 = smov 0  }
   0x2   :  { %s1438_s22 = smov 0   ;;  %s1440_s23 = smov 0  }
   0x3   :  { %s1442_s24 = smov 0  }
   0x4 LB: > { %1780 = sst [smem:[#allocation4_spill]] %s1357_s22  ;;  %s24_s25 = sadd.s32 1, %s1357_s22  ;;  %s1365_s24 = sphi %s1442_s24, %s15_s24   ;;  %s1361_s23 = sphi %s1440_s23, %s1799_s23   ;;  %s1357_s22 = sphi %s1438_s22, %s1798_s22   ;;  %s1353_s21 = sphi %s1436_s21, %s1797_s21   ;;  %s1349_s20 = sphi %s1434_s20, %s1796_s20   ;;  %s1345_s19 = sphi %s1432_s19, %s1801_s19   ;;  %s1341_s18 = sphi %s1430_s18, %s1800_s18  }
   0x5   : > { %1781 = sst [smem:[#allocation5_spill]] %s1361_s23  ;;  %p25_p0 = scmp.ge.s32.totalorder %s24_s25, 4 }
   0x6   : > { %s27_s26 = sadd.s32 1, %s1361_s23  ;;  %s1079_s27 = sadd.s32 4294967295, %s1365_s24  }
   0x7   : > { %p188_p1 = scmp.ne.s32.totalorder %s1345_s19, %s1341_s18  ;;  %s1803_s25 = smov (%p25_p0, %s24_s25), 0 }
   0x8   : > { %1782 = sst [smem:[#allocation6_spill]] %s1803_s25  ;;  %s1805_s26 = smov (!%p25_p0, %s27_s26), %s1361_s23 }
   0x9   : > { %s174_s28 = ssub.s32 %s1357_s22, %s1803_s25  ;;  %p189_p2 = scmp.eq.s32.totalorder %s1079_s27, 7 }
   0xa   : > { %p29_p3 = scmp.ge.s32.totalorder %s1805_s26, 2  ;;  %p1089_p4 = scmp.ge.s32.totalorder %s1365_s24, 1 }
   0xb   : > { %p1476_p5 = por %p189_p2, %p188_p1  ;;  %p278_p6 = scmp.lt.s32.totalorder %s1365_s24, 9 }
   0xc   : > { %s1807_s26 = smov (%p29_p3, %s1805_s26), 0  ;;  %s178_s7 = sadd.s32 1, %s1345_s19 }
   0xd   : > { %1784 = sst [smem:[#allocation7_spill]] %s1807_s26  ;;  %p279_p7 = pnand %p1089_p4, %p278_p6 }
   0xe   : > { %s173_s30 = ssub.s32 %s1361_s23, %s1807_s26  ;;  %s334_s9 = sand.u32 (!%p279_p7), 1, %s1341_s18  }
   0xf   : > { %s175_s6 = sor.u32 %s174_s28, %s173_s30  ;;  %s1491_s10 = sshll.u32 (!%p279_p7), %s1349_s20, 2 }
  0x10   : > { %p176_p8 = scmp.eq.s32.totalorder %s175_s6, 0  ;;  %282 = sbr.rel (%p279_p7) target bundleno = 243 (0xf3), region = 40 }
  0x11   : > { %s1090_s11 = sshll.u32 (!%p279_p7), %s334_s9, 5  ;;  %s1092_s12 = sadd.s32 (!%p279_p7), 4294967295, %s1491_s10 }
  0x12   : > { %s1487_s8 = scalar_select %p176_p8, %s1345_s19, %s178_s7  }
  0x13   : > { %p339_p9 = scmp.gt.s32.totalorder (!%p279_p7), %s1092_s12, 0  ;;  %p341_p10 = scmp.lt.s32.totalorder (!%p279_p7), %s1353_s21, 1 }
  0x14   : > { %1785 = sst [smem:[#allocation8_spill]] %s1487_s8  ;;  %p1093_p11 = scmp.lt.s32.totalorder (!%p279_p7), %s1092_s12, 12 }
  0x15   : > { %s1809_s12 = smov (!%p339_p9, %s1092_s12), 0  ;;  %p360_p12 = scmp.lt.s32.totalorder %s1491_s10, 12 }
  0x16   : > { %s342_s13 = scalar_select %p341_p10, %s1353_s21, 1 }
  0x17   : > { %s1811_s12 = smov (!%p1093_p11, %s1809_s12), 12  ;;  %s1142_s15 = sadd.s32 4, %s1491_s10 }
  0x18   : > { %s1147_s14 = smul.u32 13, %s342_s13  ;;  %p373_p13 = scmp.lt.s32.totalorder %s1142_s15, 12 }
  0x19   : > { %s361_s30 = scalar_select %p360_p12, %s1491_s10, 12 }
  0x1a   : > { %s346_s16 = sadd.s32 %s1147_s14, %s1811_s12  ;;  %s1813_s15 = smov (!%p373_p13, %s1142_s15), 12 }
  0x1b   : > { %s1098_s17 = sshll.u32 %s346_s16, 3  ;;  %s363_s6 = sadd.s32 %s1147_s14, %s361_s30 }
  0x1c   : > { %s348_s28 = scalar_lea.vmem %s1770_s0, %s1098_s17  ;;  %s1100_s7 = sshll.u32 %s363_s6, 3 }
  0x1d   : > { %s1505_s25 = scalar_lea.vmem %s1771_s1, %s1100_s7  ;;  %s1815_s15 = smov (!%p373_p13, %s1813_s15), 12 }
  0x1e   : > { %s380_s13 = sadd.s32 %s1147_s14, %s1815_s15  ;;  %s1512_s8 = scalar_lea.vmem [#allocation3], %s1090_s11  }
  0x1f   : > { %s1105_s23 = sshll.u32 %s380_s13, 3  ;;  %p1106_p0 = scmp.ne.s32.totalorder %s1349_s20, 0 }
  0x20   : > { %s1510_s16 = scalar_lea.vmem %s1772_s2, %s1105_s23 }
  0x21   : > { %395 = sbr.rel (%p1106_p0) target bundleno = 40 (0x28), region = 44 }
  0x26   : > { %v1399_v0 = vmov 0.0  }
  0x27   : > { %396 = vst [vmem:[#allocation2 + $0x28] sm:$0xff] %v1399_v0 }
  0x28 PF: > { %p1107_p1 = scmp.le.s32.totalorder %s1349_s20, 0 }
  0x2a   : > { %400 = sbr.rel (%p1107_p1) target bundleno = 49 (0x31), region = 48 }
  0x2f   : > { %v401_v1 = vld [vmem:[%s348_s28] sm:$0xff] }
  0x30   : > { %402 = vst [vmem:[#allocation2 + $0x28] sm:$0xff] %v401_v1 }
  0x31 PF: > { %s1143_s26 = sshll.u32 %s1349_s20, 5 }
  0x32   : > { %s1517_s14 = sadd.s32 32, %s1143_s26 }
  0x33   : > { %p1109_p2 = scmp.gt.s32.totalorder %s1517_s14, 100 }
  0x35   : > { %409 = sbr.rel (%p1109_p2) target bundleno = 63 (0x3f), region = 52 }
  0x3a   : > { %v410_v2 = vld [vmem:[%s1505_s25] sm:$0xff]  ;;  %v411_v3 = vld [vmem:[%s1505_s25 + $0x8] sm:$0xff]  ;;  %v412_v4 = vld [vmem:[%s1505_s25 + $0x10] sm:$0xff] }
  0x3b   : > { %414 = vst [vmem:[#allocation2 + $0x10] sm:$0xff] %v410_v2  ;;  %v413_v5 = vld [vmem:[%s1505_s25 + $0x18] sm:$0xff] }
  0x3c   : > { %415 = vst [vmem:[#allocation2 + $0x8] sm:$0xff] %v411_v3 }
  0x3d   : > { %416 = vst [vmem:[#allocation2] sm:$0xff] %v412_v4 }
  0x3e   : > { %417 = vst [vmem:[#allocation2 + $0x18] sm:$0xff] %v413_v5 }
  0x3f PF: > { %p1110_p3 = scmp.le.s32.totalorder %s1517_s14, 100 }
  0x41   : > { %420 = sbr.rel (%p1110_p3) target bundleno = 83 (0x53), region = 56 }
  0x46   : > { %v425_v6 = vlaneseq  ;;  %v431_v7 = vstv %s1143_s26  ;;  %v421_v9 = vld [vmem:[%s1505_s25] sm:$0xff]  ;;  %v422_v14 = vld [vmem:[%s1505_s25 + $0x8] sm:$0xff]  ;;  %v423_v16 = vld [vmem:[%s1505_s25 + $0x10] sm:$0xff] }
  0x47   : > { %v424_v18 = vld [vmem:[%s1505_s25 + $0x18] sm:$0xff] }
  0x48   : > { %v426_v8 = vshrl.u32 %v425_v6, 7 }
  0x4a   : > { %v432_v10 = vadd.s32 %v431_v7, %v426_v8  ;;  %v427_v11 = vadd.s32 8, %v426_v8  ;;  %v428_v12 = vadd.s32 16, %v426_v8  ;;  %v429_v13 = vadd.s32 24, %v426_v8 }
  0x4c   : > { %vm436_vm0 = vcmp.lt.s32.totalorder %v432_v10, 100  ;;  %v433_v15 = vadd.s32 %v431_v7, %v427_v11  ;;  %v434_v17 = vadd.s32 %v431_v7, %v428_v12  ;;  %v435_v19 = vadd.s32 %v431_v7, %v429_v13 }
  0x4d   : > { %v448_v20 = vsel %vm436_vm0, %v421_v9, 0.0 }
  0x4e   : > { %452 = vst [vmem:[#allocation2 + $0x10] sm:$0xff] %v448_v20  ;;  %vm437_vm1 = vcmp.lt.s32.totalorder %v433_v15, 100  ;;  %vm438_vm2 = vcmp.lt.s32.totalorder %v434_v17, 100  ;;  %vm439_vm3 = vcmp.lt.s32.totalorder %v435_v19, 100 }
  0x4f   : > { %v449_v21 = vsel %vm437_vm1, %v422_v14, 0.0  ;;  %v450_v22 = vsel %vm438_vm2, %v423_v16, 0.0  ;;  %v451_v23 = vsel %vm439_vm3, %v424_v18, 0.0 }
  0x50   : > { %453 = vst [vmem:[#allocation2 + $0x8] sm:$0xff] %v449_v21 }
  0x51   : > { %454 = vst [vmem:[#allocation2] sm:$0xff] %v450_v22 }
  0x52   : > { %455 = vst [vmem:[#allocation2 + $0x18] sm:$0xff] %v451_v23 }
  0x53 PF: > { %s456_s20 = sadd.s32 8, %s1517_s14 }
  0x54   : > { %p1112_p4 = scmp.gt.s32.totalorder %s456_s20, 100 }
  0x56   : > { %460 = sbr.rel (%p1112_p4) target bundleno = 93 (0x5d), region = 60 }
  0x5b   : > { %v461_v24 = vld [vmem:[%s1510_s16] sm:$0xff] }
  0x5c   : > { %462 = vst [vmem:[#allocation2 + $0x20] sm:$0xff] %v461_v24 }
  0x5d PF: > { %p1113_p6 = scmp.le.s32.totalorder %s456_s20, 100 }
  0x5f   : > { %466 = sbr.rel (%p1113_p6) target bundleno = 109 (0x6d), region = 64 }
  0x64   : > { %v468_v25 = vlaneseq  ;;  %v470_v26 = vstv %s1517_s14  ;;  %v467_v28 = vld [vmem:[%s1510_s16] sm:$0xff] }
  0x66   : > { %v469_v27 = vshrl.u32 %v468_v25, 7 }
  0x68   : > { %v471_v29 = vadd.s32 %v470_v26, %v469_v27 }
  0x6a   : > { %vm472_vm4 = vcmp.lt.s32.totalorder %v471_v29, 100 }
  0x6b   : > { %v475_v30 = vsel %vm472_vm4, %v467_v28, 0.0 }
  0x6c   : > { %476 = vst [vmem:[#allocation2 + $0x20] sm:$0xff] %v475_v30 }
  0x6d PF: > { %v1536_v31 = vld [vmem:[%s1773_s3] sm:$0x7f]  ;;  %v493_v32 = vlaneseq  ;;  %v482_v33 = vld [vmem:[#allocation2 + $0x28] sm:$0xff]  ;;  %v1538_v34 = vld [vmem:[#allocation2 + $0x10] sm:$0xff]  ;;  %s801_s15 = ssub.s32 (%p1476_p5), 13, %s1491_s10  ;;  %s1148_s17 = smul.u32 (%p1476_p5), 13, %s1353_s21 }
  0x6e   : > { %v1540_v35 = vld [vmem:[#allocation2 + $0x8] sm:$0xff]  ;;  %v500_v36 = vperm.slane %v1536_v31, 0  ;;  %v519_v37 = vperm.slane %v1536_v31, 1  ;;  %v1544_v38 = vld [vmem:[#allocation2] sm:$0xff]  ;;  %v1546_v39 = vld [vmem:[#allocation2 + $0x18] sm:$0xff]  ;;  %v488_v40 = vrot.slane %v482_v33, 5 }
  0x6f   : > { %v489_v41 = vrot.slane %v1538_v34, 5  ;;  %v490_v42 = vrot.slane %v1540_v35, 5  ;;  %v538_v43 = vperm.slane %v1536_v31, 2  ;;  %v491_v44 = vrot.slane %v1544_v38, 5  ;;  %v1270_v52 = vld [vmem:[%s1774_s4] ss:$0 sm:$0xff]  ;;  %s807_s18 = sadd.s32 (%p1476_p5), %s1148_s17, %s1491_s10 }
  0x70   : > { %v492_v45 = vrot.slane %v1546_v39, 5  ;;  %v1553_v46 = vshrl.u32 %v493_v32, 7  ;;  %v509_v47 = vrot.slane %v482_v33, 6  ;;  %v510_v48 = vrot.slane %v1538_v34, 6  ;;  %p802_p7 = scmp.lt.s32.totalorder (%p1476_p5), %s801_s15, 4  ;;  %s1122_s27 = sshll.u32 (%p1476_p5), %s807_s18, 3 }
  0x71   : > { %v511_v49 = vrot.slane %v1540_v35, 6  ;;  %v512_v50 = vrot.slane %v1544_v38, 6  ;;  %v513_v51 = vrot.slane %v1546_v39, 6  ;;  %v528_v53 = vrot.slane %v482_v33, 7  ;;  %s1713_s7 = scalar_lea.vmem (%p1476_p5), %s1775_s5, %s1122_s27  }
  0x72   : > { %vm495_vm5 = vcmp.lt.s32.totalorder %v1553_v46, 3  ;;  %vm514_vm6 = vcmp.lt.s32.totalorder %v1553_v46, 2  ;;  %v529_v54 = vrot.slane %v1538_v34, 7  ;;  %v530_v11 = vrot.slane %v1540_v35, 7 }
  0x73   : > { %v496_v55 = vsel %vm495_vm5, %v491_v44, %v492_v45  ;;  %v497_v56 = vsel %vm495_vm5, %v490_v42, %v491_v44  ;;  %v498_v57 = vsel %vm495_vm5, %v489_v41, %v490_v42  ;;  %v499_v58 = vsel %vm495_vm5, %v488_v40, %v489_v41  ;;  %v487_v26 = vld [vmem:[#allocation2 + $0x20] sm:$0xff] }
  0x74   : > { %v501_v59 = vmul.f32 %v500_v36, %v499_v58  ;;  %v502_v60 = vmul.f32 %v500_v36, %v498_v57  ;;  %v503_v61 = vmul.f32 %v500_v36, %v497_v56  ;;  %v504_v62 = vmul.f32 %v500_v36, %v496_v55 }
  0x75   : > { %v515_v63 = vsel %vm514_vm6, %v512_v50, %v513_v51  ;;  %v516_v0 = vsel %vm514_vm6, %v511_v49, %v512_v50  ;;  %v517_v1 = vsel %vm514_vm6, %v510_v48, %v511_v49  ;;  %v518_v2 = vsel %vm514_vm6, %v509_v47, %v510_v48 }
  0x76   : > { %v505_v3 = vadd.f32 %v1270_v52, %v501_v59  ;;  %v506_v4 = vadd.f32 %v1270_v52, %v502_v60  ;;  %v507_v5 = vadd.f32 %v1270_v52, %v503_v61  ;;  %v508_v6 = vadd.f32 %v1270_v52, %v504_v62 }
  0x77   : > { %v520_v7 = vmul.f32 %v519_v37, %v518_v2  ;;  %v521_v8 = vmul.f32 %v519_v37, %v517_v1  ;;  %v522_v9 = vmul.f32 %v519_v37, %v516_v0  ;;  %v523_v10 = vmul.f32 %v519_v37, %v515_v63 }
  0x78   : > { %v531_v12 = vrot.slane %v1544_v38, 7  ;;  %v532_v13 = vrot.slane %v1546_v39, 7  ;;  %vm533_vm7 = vcmp.lt.s32.totalorder %v1553_v46, 1  ;;  %v547_v27 = vperm.slane %v1536_v31, 3 }
  0x79   : > { %v524_v14 = vadd.f32 %v520_v7, %v505_v3  ;;  %v525_v15 = vadd.f32 %v521_v8, %v506_v4  ;;  %v526_v16 = vadd.f32 %v522_v9, %v507_v5  ;;  %v527_v17 = vadd.f32 %v523_v10, %v508_v6 }
  0x7a   : > { %v534_v18 = vsel %vm533_vm7, %v531_v12, %v532_v13  ;;  %v535_v19 = vsel %vm533_vm7, %v530_v11, %v531_v12  ;;  %v536_v20 = vsel %vm533_vm7, %v529_v54, %v530_v11  ;;  %v537_v21 = vsel %vm533_vm7, %v528_v53, %v529_v54 }
  0x7b   : > { %v539_v22 = vmul.f32 %v538_v43, %v537_v21  ;;  %v540_v23 = vmul.f32 %v538_v43, %v536_v20  ;;  %v541_v24 = vmul.f32 %v538_v43, %v535_v19  ;;  %v542_v25 = vmul.f32 %v538_v43, %v534_v18 }
  0x7c   : > { %v556_v28 = vrot.slane %v1538_v34, 1  ;;  %v557_v29 = vrot.slane %v1540_v35, 1  ;;  %v558_v30 = vrot.slane %v1544_v38, 1  ;;  %v548_v40 = vmul.f32 %v547_v27, %v1538_v34 }
  0x7d   : > { %v543_v32 = vadd.f32 %v539_v22, %v524_v14  ;;  %v544_v33 = vadd.f32 %v540_v23, %v525_v15  ;;  %v545_v36 = vadd.f32 %v541_v24, %v526_v16  ;;  %v546_v37 = vadd.f32 %v542_v25, %v527_v17 }
  0x7e   : > { %v549_v41 = vmul.f32 %v547_v27, %v1540_v35  ;;  %v550_v42 = vmul.f32 %v547_v27, %v1544_v38  ;;  %v551_v43 = vmul.f32 %v547_v27, %v1546_v39  ;;  %v559_v44 = vrot.slane %v1546_v39, 1 }
  0x7f   : > { %v560_v45 = vrot.slane %v487_v26, 1  ;;  %vm561_vm8 = vcmp.lt.s32.totalorder %v1553_v46, 7  ;;  %v566_v47 = vperm.slane %v1536_v31, 4  ;;  %v552_v48 = vadd.f32 %v548_v40, %v543_v32 }
  0x80   : > { %v553_v49 = vadd.f32 %v549_v41, %v544_v33  ;;  %v554_v50 = vadd.f32 %v550_v42, %v545_v36  ;;  %v555_v51 = vadd.f32 %v551_v43, %v546_v37  ;;  %v563_v53 = vsel %vm561_vm8, %v558_v30, %v559_v44 }
  0x81   : > { %v562_v52 = vsel %vm561_vm8, %v559_v44, %v560_v45  ;;  %v564_v54 = vsel %vm561_vm8, %v557_v29, %v558_v30  ;;  %v565_v55 = vsel %vm561_vm8, %v556_v28, %v557_v29  ;;  %v569_v58 = vmul.f32 %v566_v47, %v563_v53 }
  0x82   : > { %v567_v56 = vmul.f32 %v566_v47, %v565_v55  ;;  %v568_v57 = vmul.f32 %v566_v47, %v564_v54  ;;  %v570_v59 = vmul.f32 %v566_v47, %v562_v52  ;;  %v575_v60 = vrot.slane %v1538_v34, 2 }
  0x83   : > { %v576_v61 = vrot.slane %v1540_v35, 2  ;;  %v577_v62 = vrot.slane %v1544_v38, 2  ;;  %v578_v63 = vrot.slane %v1546_v39, 2  ;;  %v573_v2 = vadd.f32 %v569_v58, %v554_v50 }
  0x84   : > { %v571_v0 = vadd.f32 %v567_v56, %v552_v48  ;;  %v572_v1 = vadd.f32 %v568_v57, %v553_v49  ;;  %v574_v3 = vadd.f32 %v570_v59, %v555_v51  ;;  %v579_v4 = vrot.slane %v487_v26, 2 }
  0x85   : > { %vm580_vm9 = vcmp.lt.s32.totalorder %v1553_v46, 6  ;;  %v585_v5 = vperm.slane %v1536_v31, 5  ;;  %v594_v6 = vrot.slane %v1538_v34, 3  ;;  %v595_v10 = vrot.slane %v1540_v35, 3 }
  0x86   : > { %v582_v7 = vsel %vm580_vm9, %v577_v62, %v578_v63  ;;  %v583_v8 = vsel %vm580_vm9, %v576_v61, %v577_v62  ;;  %v584_v9 = vsel %vm580_vm9, %v575_v60, %v576_v61  ;;  %v581_v11 = vsel %vm580_vm9, %v578_v63, %v579_v4 }
  0x87   : > { %v586_v12 = vmul.f32 %v585_v5, %v584_v9  ;;  %v587_v13 = vmul.f32 %v585_v5, %v583_v8  ;;  %v588_v14 = vmul.f32 %v585_v5, %v582_v7  ;;  %v589_v15 = vmul.f32 %v585_v5, %v581_v11 }
  0x88   : > { %v596_v16 = vrot.slane %v1544_v38, 3  ;;  %v597_v17 = vrot.slane %v1546_v39, 3  ;;  %v598_v18 = vrot.slane %v487_v26, 3  ;;  %vm599_vm10 = vcmp.lt.s32.totalorder %v1553_v46, 5 }
  0x89   : > { %v590_v19 = vadd.f32 %v586_v12, %v571_v0  ;;  %v591_v20 = vadd.f32 %v587_v13, %v572_v1  ;;  %v592_v23 = vadd.f32 %v588_v14, %v573_v2  ;;  %v593_v24 = vadd.f32 %v589_v15, %v574_v3 }
  0x8a   : > { %v600_v34 = vsel %vm599_vm10, %v597_v17, %v598_v18  ;;  %v601_v21 = vsel %vm599_vm10, %v596_v16, %v597_v17  ;;  %v602_v22 = vsel %vm599_vm10, %v595_v10, %v596_v16  ;;  %v603_v35 = vsel %vm599_vm10, %v594_v6, %v595_v10 }
  0x8b   : > { %v604_v25 = vperm.slane %v1536_v31, 6 }
  0x8d   : > { %v605_v27 = vmul.f32 %v604_v25, %v603_v35  ;;  %v606_v28 = vmul.f32 %v604_v25, %v602_v22  ;;  %v607_v29 = vmul.f32 %v604_v25, %v601_v21  ;;  %v608_v30 = vmul.f32 %v604_v25, %v600_v34 }
  0x8f   : > { %v1592_v38 = vadd.f32 %v605_v27, %v590_v19  ;;  %v1594_v39 = vadd.f32 %v606_v28, %v591_v20  ;;  %v1596_v26 = vadd.f32 %v607_v29, %v592_v23  ;;  %v1598_v46 = vadd.f32 %v608_v30, %v593_v24 }
  0x91   : > { %v1601_v32 = vmul.f32 0.70710677, %v1592_v38  ;;  %v1604_v33 = vmul.f32 0.70710677, %v1594_v39  ;;  %v1607_v31 = vmul.f32 0.70710677, %v1596_v26 }
  0x92   : > { %v1610_v36 = vmul.f32 0.70710677, %v1598_v46 }
  0x93   : > { %v621_v37 = vmul.f32 %v1601_v32, %v1601_v32  ;;  %v661_v40 = vmul.f32 %v1604_v33, %v1604_v33  ;;  %v701_v41 = vmul.f32 %v1607_v31, %v1607_v31 }
  0x94   : > { %v741_v42 = vmul.f32 %v1610_v36, %v1610_v36 }
  0x95   : > { %v1620_v43 = vmin.f32 %v621_v37, 16.0  ;;  %v1622_v44 = vmin.f32 %v661_v40, 16.0  ;;  %v1624_v45 = vmin.f32 %v701_v41, 16.0 }
  0x96   : > { %v1626_v47 = vmin.f32 %v741_v42, 16.0 }
  0x97   : > { %v623_v48 = vmul.f32 2.1237322e-06, %v1620_v43  ;;  %v634_v49 = vmul.f32 3.8918573e-05, %v1620_v43  ;;  %v663_v50 = vmul.f32 2.1237322e-06, %v1622_v44 }
  0x98   : > { %v674_v51 = vmul.f32 3.8918573e-05, %v1622_v44  ;;  %v703_v52 = vmul.f32 2.1237322e-06, %v1624_v45  ;;  %v714_v53 = vmul.f32 3.8918573e-05, %v1624_v45 }
  0x99   : > { %v624_v54 = vadd.f32 0.00028619796, %v623_v48  ;;  %v635_v55 = vadd.f32 0.001143296, %v634_v49  ;;  %v664_v56 = vadd.f32 0.00028619796, %v663_v50 }
  0x9a   : > { %v675_v57 = vadd.f32 0.001143296, %v674_v51  ;;  %v704_v58 = vadd.f32 0.00028619796, %v703_v52  ;;  %v715_v59 = vadd.f32 0.001143296, %v714_v53 }
  0x9b   : > { %v625_v60 = vmul.f32 %v624_v54, %v1620_v43  ;;  %v636_v61 = vmul.f32 %v635_v55, %v1620_v43  ;;  %v665_v62 = vmul.f32 %v664_v56, %v1622_v44  ;;  %v743_v63 = vmul.f32 2.1237322e-06, %v1626_v47 }
  0x9c   : > { %v676_v0 = vmul.f32 %v675_v57, %v1622_v44  ;;  %v705_v1 = vmul.f32 %v704_v58, %v1624_v45  ;;  %v716_v2 = vmul.f32 %v715_v59, %v1624_v45  ;;  %v754_v3 = vmul.f32 3.8918573e-05, %v1626_v47 }
  0x9d   : > { %v626_v4 = vadd.f32 0.0036580483, %v625_v60  ;;  %v637_v5 = vadd.f32 0.014752088, %v636_v61  ;;  %v666_v6 = vadd.f32 0.0036580483, %v665_v62 }
  0x9e   : > { %v677_v7 = vadd.f32 0.014752088, %v676_v0  ;;  %v706_v8 = vadd.f32 0.0036580483, %v705_v1  ;;  %v717_v9 = vadd.f32 0.014752088, %v716_v2 }
  0x9f   : > { %v627_v10 = vmul.f32 %v626_v4, %v1620_v43  ;;  %v638_v11 = vmul.f32 %v637_v5, %v1620_v43  ;;  %v667_v12 = vmul.f32 %v666_v6, %v1622_v44  ;;  %v744_v13 = vadd.f32 0.00028619796, %v743_v63 }
  0xa0   : > { %v678_v14 = vmul.f32 %v677_v7, %v1622_v44  ;;  %v707_v15 = vmul.f32 %v706_v8, %v1624_v45  ;;  %v718_v16 = vmul.f32 %v717_v9, %v1624_v45  ;;  %v755_v17 = vadd.f32 0.001143296, %v754_v3 }
  0xa1   : > { %v628_v18 = vadd.f32 0.05243302, %v627_v10  ;;  %v639_v19 = vadd.f32 0.112945676, %v638_v11  ;;  %v668_v20 = vadd.f32 0.05243302, %v667_v12  ;;  %v745_v34 = vmul.f32 %v744_v13, %v1626_v47 }
  0xa2   : > { %v679_v21 = vadd.f32 0.112945676, %v678_v14  ;;  %v708_v22 = vadd.f32 0.05243302, %v707_v15  ;;  %v719_v23 = vadd.f32 0.112945676, %v718_v16  ;;  %v756_v24 = vmul.f32 %v755_v17, %v1626_v47 }
  0xa3   : > { %v629_v35 = vmul.f32 %v628_v18, %v1620_v43  ;;  %v640_v25 = vmul.f32 %v639_v19, %v1620_v43  ;;  %v746_v29 = vadd.f32 0.0036580483, %v745_v34  ;;  %v669_v41 = vmul.f32 %v668_v20, %v1622_v44 }
  0xa4   : > { %v680_v27 = vmul.f32 %v679_v21, %v1622_v44  ;;  %v720_v28 = vmul.f32 %v719_v23, %v1624_v45  ;;  %v757_v30 = vadd.f32 0.014752088, %v756_v24  ;;  %v709_v42 = vmul.f32 %v708_v22, %v1624_v45 }
  0xa5   : > { %v630_v37 = vadd.f32 0.18741608, %v629_v35  ;;  %v641_v40 = vadd.f32 0.4994258, %v640_v25  ;;  %v747_v54 = vmul.f32 %v746_v29, %v1626_v47  ;;  %v670_v58 = vadd.f32 0.18741608, %v669_v41 }
  0xa6   : > { %v681_v48 = vadd.f32 0.4994258, %v680_v27  ;;  %v721_v49 = vadd.f32 0.4994258, %v720_v28  ;;  %v758_v50 = vmul.f32 %v757_v30, %v1626_v47  ;;  %v710_v59 = vadd.f32 0.18741608, %v709_v42 }
  0xa7   : > { %v642_v51 = vmul.f32 %v641_v40, %v1620_v43  ;;  %v631_v56 = vmul.f32 %v630_v37, %v1620_v43  ;;  %v748_v62 = vadd.f32 0.05243302, %v747_v54  ;;  %v671_v1 = vmul.f32 %v670_v58, %v1622_v44 }
  0xa8   : > { %v682_v52 = vmul.f32 %v681_v48, %v1622_v44  ;;  %v722_v53 = vmul.f32 %v721_v49, %v1624_v45  ;;  %v759_v55 = vadd.f32 0.112945676, %v758_v50  ;;  %v711_v2 = vmul.f32 %v710_v59, %v1624_v45 }
  0xa9   : > { %v643_v57 = vadd.f32 1.0, %v642_v51  ;;  %v632_v0 = vadd.f32 1.1283791, %v631_v56  ;;  %v749_v3 = vmul.f32 %v748_v62, %v1626_v47  ;;  %v672_v7 = vadd.f32 1.1283791, %v671_v1 }
  0xaa   : > { %v683_v60 = vadd.f32 1.0, %v682_v52  ;;  %v723_v61 = vadd.f32 1.0, %v722_v53  ;;  %v760_v63 = vmul.f32 %v759_v55, %v1626_v47  ;;  %v712_v8 = vadd.f32 1.1283791, %v711_v2 }
  0xab   : > { %1271 = vrcp.f32 %v643_v57  ;;  %v633_v5 = vmul.f32 %v632_v0, %v1601_v32  ;;  %v655_v6 = vand.u32 2147483648, %v643_v57  ;;  %vm649_vm11 = vweird.f32 %v643_v57 }
  0xac   : > { %1273 = vrcp.f32 %v683_v60  ;;  %v761_v4 = vadd.f32 0.4994258, %v760_v63  ;;  %v653_v11 = vand.u32 2147483647, %v643_v57  ;;  %vm689_vm12 = vweird.f32 %v683_v60 }
  0xad   : > { %1275 = vrcp.f32 %v723_v61  ;;  %v693_v44 = vand.u32 2147483647, %v683_v60  ;;  %v695_v45 = vand.u32 2147483648, %v683_v60  ;;  %v750_v16 = vadd.f32 0.18741608, %v749_v3 }
  0xae   : > { %v762_v12 = vmul.f32 %v761_v4, %v1626_v47  ;;  %v656_v18 = vor.u32 1.1754944e-38, %v655_v6  ;;  %vm729_vm15 = vweird.f32 %v723_v61  ;;  %v735_v34 = vand.u32 2147483648, %v723_v61 }
  0xaf   : > { %v733_v24 = vand.u32 2147483647, %v723_v61  ;;  %vm654_vm2 = vcmp.eq.f32.partialorder %v653_v11, 8.507059e+37  ;;  %v696_v27 = vor.u32 1.1754944e-38, %v695_v45  ;;  %v751_v28 = vmul.f32 %v750_v16, %v1626_v47 }
  0xb0   : > { %v763_v17 = vadd.f32 1.0, %v762_v12  ;;  %v673_v29 = vmul.f32 %v672_v7, %v1604_v33  ;;  %vm694_vm4 = vcmp.eq.f32.partialorder %v693_v44, 8.507059e+37  ;;  %v613_v40 = vmul.f32 0.5, %v1592_v38 }
  0xb1   : > { %v1272_v43 = vpop.eup %1271  ;;  %v713_v42 = vmul.f32 %v712_v8, %v1607_v31  ;;  %v736_v49 = vor.u32 1.1754944e-38, %v735_v34  ;;  %vm734_vm6 = vcmp.eq.f32.partialorder %v733_v24, 8.507059e+37  ;;  %v614_v38 = vmul.f32 0.5, %v1594_v39 }
  0xb2   : > { %v1274_v9 = vpop.eup %1273  ;;  %v645_v10 = vmul.f32 %v1272_v43, %v643_v57  ;;  %vm650_vm13 = vweird.f32 %v1272_v43  ;;  %1277 = vrcp.f32 %v763_v17  ;;  %v752_v54 = vadd.f32 1.1283791, %v751_v28 }
  0xb3   : > { %v685_v13 = vmul.f32 %v1274_v9, %v683_v60  ;;  %v1276_v14 = vpop.eup %1275  ;;  %vm690_vm14 = vweird.f32 %v1274_v9  ;;  %vm1669_vm0 = vmor %vm649_vm11, %vm650_vm13  ;;  %vm769_vm7 = vweird.f32 %v763_v17  ;;  %v773_v59 = vand.u32 2147483647, %v763_v17 }
  0xb4   : > { %v646_v15 = vsub.f32 1.0, %v645_v10  ;;  %v725_v19 = vmul.f32 %v1276_v14, %v723_v61  ;;  %vm730_vm1 = vweird.f32 %v1276_v14  ;;  %vm1674_vm3 = vmor %vm689_vm12, %vm690_vm14  ;;  %v775_v60 = vand.u32 2147483648, %v763_v17 }
  0xb5   : > { %v686_v32 = vsub.f32 1.0, %v685_v13  ;;  %vm1685_vm5 = vmor %vm729_vm15, %vm730_vm1  ;;  %v615_v39 = vmul.f32 0.5, %v1596_v26  ;;  %v753_v4 = vmul.f32 %v752_v54, %v1610_v36  ;;  %vm774_vm10 = vcmp.eq.f32.partialorder %v773_v59, 8.507059e+37 }
  0xb6   : > { %v647_v20 = vmul.f32 %v1272_v43, %v646_v15  ;;  %v726_v23 = vsub.f32 1.0, %v725_v19  ;;  %v616_v12 = vmul.f32 0.5, %v1598_v46 }
  0xb7   : > { %v687_v22 = vmul.f32 %v1274_v9, %v686_v32 }
  0xb8   : > { %v648_v35 = vadd.f32 %v1272_v43, %v647_v20  ;;  %v727_v37 = vmul.f32 %v1276_v14, %v726_v23  ;;  %v1278_v51 = vpop.eup %1277 }
  0xb9   : > { %v688_v30 = vadd.f32 %v1274_v9, %v687_v22  ;;  %v765_v56 = vmul.f32 %v1278_v51, %v763_v17  ;;  %vm770_vm8 = vweird.f32 %v1278_v51 }
  0xba   : > { %v652_v41 = vsel %vm1669_vm0, %v1272_v43, %v648_v35  ;;  %v728_v47 = vadd.f32 %v1276_v14, %v727_v37  ;;  %vm771_vm9 = vmor %vm769_vm7, %vm770_vm8  ;;  %v776_v43 = vor.u32 1.1754944e-38, %v775_v60 }
  0xbb   : > { %v657_v50 = vsel %vm654_vm2, %v656_v18, %v652_v41  ;;  %v692_v33 = vsel %vm1674_vm3, %v1274_v9, %v688_v30  ;;  %v766_v63 = vsub.f32 1.0, %v765_v56 }
  0xbc   : > { %v658_v52 = vmul.f32 %v657_v50, %v633_v5  ;;  %v697_v53 = vsel %vm694_vm4, %v696_v27, %v692_v33  ;;  %v732_v31 = vsel %vm1685_vm5, %v1276_v14, %v728_v47 }
  0xbd   : > { %v698_v55 = vmul.f32 %v697_v53, %v673_v29  ;;  %v737_v58 = vsel %vm734_vm6, %v736_v49, %v732_v31  ;;  %v767_v2 = vmul.f32 %v1278_v51, %v766_v63 }
  0xbe   : > { %v1114_v57 = vclamps-f32 %v658_v52, 1.0  ;;  %v738_v62 = vmul.f32 %v737_v58, %v713_v42 }
  0xbf   : > { %v1115_v61 = vclamps-f32 %v698_v55, 1.0  ;;  %v768_v6 = vadd.f32 %v1278_v51, %v767_v2 }
  0xc0   : > { %v781_v0 = vadd.f32 1.0, %v1114_v57  ;;  %v1116_v1 = vclamps-f32 %v738_v62, 1.0 }
  0xc1   : > { %v782_v3 = vadd.f32 1.0, %v1115_v61  ;;  %v772_v9 = vsel %vm771_vm9, %v1278_v51, %v768_v6 }
  0xc2   : > { %v785_v5 = vmul.f32 %v781_v0, %v613_v40  ;;  %v783_v7 = vadd.f32 1.0, %v1116_v1  ;;  %v777_v26 = vsel %vm774_vm10, %v776_v43, %v772_v9 }
  0xc3   : > { %v786_v8 = vmul.f32 %v782_v3, %v614_v38  ;;  %v778_v11 = vmul.f32 %v777_v26, %v753_v4 }
  0xc4   : > { %789 = vst [vmem:[%s1512_s8] sm:$0xff] %v785_v5  ;;  %v787_v10 = vmul.f32 %v783_v7, %v615_v39 }
  0xc5   : > { %790 = vst [vmem:[%s1512_s8 + $0x8] sm:$0xff] %v786_v8  ;;  %v1117_v13 = vclamps-f32 %v778_v11, 1.0 }
  0xc6   : > { %791 = vst [vmem:[%s1512_s8 + $0x10] sm:$0xff] %v787_v10 }
  0xc7   : > { %v784_v36 = vadd.f32 1.0, %v1117_v13  ;;  %799 = sbr.rel (!%p1476_p5) target bundleno = 243 (0xf3), region = 68 }
  0xc9   : > { %v788_v44 = vmul.f32 %v784_v36, %v616_v12 }
  0xcb   : > { %792 = vst [vmem:[%s1512_s8 + $0x18] sm:$0xff] %v788_v44 }
  0xcc   : > { %s1817_s15 = smov (!%p802_p7, %s801_s15), 4 }
  0xcd   : > { %s1120_s28 = sshll.u32 %s1817_s15, 3 }
  0xce   : > { %p1123_p8 = scmp.eq.s32.totalorder %s1120_s28, 0 }
  0xcf   : > { %s1716_s29 = sshrl.u32 (!%p1123_p8), %s1817_s15, 2 }
  0xd0   : > { %812 = sbr.rel (%p1123_p8) target bundleno = 243 (0xf3), region = 72  ;;  %p1124_p5 = scmp.le.s32.totalorder (!%p1123_p8), %s1716_s29, 0 }
  0xd5   : > { %1012 = sbr.rel (%p1124_p5) target bundleno = 226 (0xe2), region = 154  ;;  %s1792_s21 = smov (!%p1124_p5), %s1713_s7 }
  0xd6   : > { %s1793_s10 = smov (!%p1124_p5), %s1512_s8  ;;  %s1725_s9 = smov (!%p1124_p5), 0  }
  0xd7   : > { %s1379_s13 = smov (!%p1124_p5), 0  }
  0xda LB: >> { %v881_v46 = vld [vmem:[%s1373_s10] sm:$0xff]  ;;  %v883_v45 = vld [vmem:[%s1373_s10 + $0x8] sm:$0xff]  ;;  %v885_v14 = vld [vmem:[%s1373_s10 + $0x10] sm:$0xff]  ;;  %s889_s12 = sadd.s32 1, %s1377_s9  ;;  %s875_s13 = sadd.s32 1, %s1381_s13   ;;  %s1381_s13 = sphi %s1379_s13, %s875_s13   ;;  %s1377_s9 = sphi %s1725_s9, %s1794_s9   ;;  %s1373_s10 = sphi %s1793_s10, %s894_s10   ;;  %s1369_s21 = sphi %s1792_s21, %s895_s21  }
  0xdb   : >> { %882 = vst [vmem:[%s1369_s21] sm:$0xff] %v881_v46  ;;  %v887_v15 = vld [vmem:[%s1373_s10 + $0x18] sm:$0xff]  ;;  %p890_p9 = scmp.ge.s32.totalorder %s889_s12, %s1716_s29  ;;  %p874_p10 = scmp.ge.s32.totalorder %s875_s13, %s1716_s29 }
  0xdc   : >> { %884 = vst [vmem:[%s1369_s21 + $0x8] sm:$0xff] %v883_v45 }
  0xdd   : >> { %886 = vst [vmem:[%s1369_s21 + $0x10] sm:$0xff] %v885_v14  ;;  %s1819_s12 = smov (%p890_p9, %s889_s12), 0  ;;  %877 = sbr.rel (!%p874_p10) target bundleno = 218 (0xda), region = 160 }
  0xde   : >> { %888 = vst [vmem:[%s1369_s21 + $0x18] sm:$0xff] %v887_v15  ;;  %s1125_s16 = sshll.u32 %s1819_s12, 5  ;;  %s1794_s9 = smov %s1819_s12 }
  0xdf   : >> { %s894_s10 = scalar_lea.vmem %s1512_s8, %s1125_s16 [#allocation3]   ;;  %s895_s21 = scalar_lea.vmem %s1713_s7, %s1125_s16  }
  0xe2 PF: > { %s1741_s26 = sand.u32 3, %s1817_s15   ;;  %s1145_s14 = sshll.u32 %s1716_s29, 5 }
  0xe3   : > { %s900_s20 = scalar_lea.vmem %s1512_s8, %s1145_s14 [#allocation3]   ;;  %s902_s22 = scalar_lea.vmem %s1713_s7, %s1145_s14  }
  0xe4   : > { %p1130_p11 = scmp.le.s32.totalorder %s1741_s26, 0 }
  0xe5   : > { %s1383_s23 = smov (!%p1130_p11), %s902_s22   ;;  %s1387_s25 = smov (!%p1130_p11), %s900_s20  }
  0xe6   : > { %1026 = sbr.rel (%p1130_p11) target bundleno = 243 (0xf3), region = 165  ;;  %s1391_s11 = smov (!%p1130_p11), 0  }
  0xe7   : > { %s1395_s17 = smov (!%p1130_p11), 0  }
  0xeb LB: >> { %v912_v16 = vld [vmem:[%s1389_s25] sm:$0xff]  ;;  %s914_s15 = sadd.s32 1, %s1393_s11  ;;  %s906_s17 = sadd.s32 1, %s1397_s17   ;;  %s1397_s17 = sphi %s1395_s17, %s906_s17   ;;  %s1393_s11 = sphi %s1391_s11, %s1392_s11   ;;  %s1389_s25 = sphi %s1387_s25, %s919_s25   ;;  %s1385_s23 = sphi %s1383_s23, %s920_s23  }
  0xec   : >> { %913 = vst [vmem:[%s1385_s23] sm:$0xff] %v912_v16  ;;  %p915_p12 = scmp.ge.s32.totalorder %s914_s15, %s1741_s26  ;;  %p905_p13 = scmp.ge.s32.totalorder %s906_s17, %s1741_s26 }
  0xee   : >> { %s1821_s15 = smov (%p915_p12, %s914_s15), 0  ;;  %908 = sbr.rel (!%p905_p13) target bundleno = 235 (0xeb), region = 171 }
  0xef   : >> { %s1131_s8 = sshll.u32 %s1821_s15, 3  ;;  %s1392_s11 = smov %s1821_s15  }
  0xf0   : >> { %s919_s25 = scalar_lea.vmem %s900_s20, %s1131_s8 [#allocation3]   ;;  %s920_s23 = scalar_lea.vmem %s902_s22, %s1131_s8  }
  0xf3 PF: > { %s15_s24 = sadd.s32 1, %s1365_s24   ;;  %s1795_s27 = sld [smem:[#allocation8_spill]] }
  0xf4   : > { %p12_p0 = scmp.ge.s32.totalorder %s15_s24, 10   ;;  %s1796_s20 = sld [smem:[#allocation4_spill]] }
  0xf5   : > { %s1797_s21 = sld [smem:[#allocation5_spill]]  ;;  %s1800_s18 = smov %s1345_s19 }
  0xf6   : > { %s1798_s22 = sld [smem:[#allocation6_spill]]  ;;  %14 = sbr.rel (!%p12_p0) target bundleno = 4 (0x4), region = 182 }
  0xf7   : > { %s1799_s23 = sld [smem:[#allocation7_spill]] }
  0xf9   : > { %s1801_s19 = smov %s1795_s27 }

</bundles_post_ra>
